<compile_context>
chip_gen: v6e
topology: v6e:2x2x1
jax: 0.10.0
libtpu: 0.0.40
codegen_flags: <defaults>
</compile_context>

<pallas_src>
import numpy as np
import jax
import jax.numpy as jnp
from jax.experimental import pallas as pl
from jax.experimental.pallas import tpu as pltpu


# --------------------------- fused Pallas kernel ------------------------------

def fused_model_kernel(x_cell_ref, x_drug_ref, adj_cd_ref, adj_dc_ref,
                       wc_ref, wd_ref, bias_ref, dec_ref, rows_ref, b2_ref,
                       out_ref):
    f32 = jnp.float32
    bf16 = jnp.bfloat16
    H = dec_ref.shape[1]

    # ---- fused feature projections: 2 wide matmuls instead of 6 narrow ones ----
    # proj_c lanes: [ lin1_c2d(x_cell)+b1 | lin2_d2c(x_cell) | lin3_d2c(x_cell)+b3 ]
    # proj_d lanes: [ lin1_d2c(x_drug)+b1 | lin2_c2d(x_drug) | lin3_c2d(x_drug)+b3 ]
    proj_c = (jnp.dot(x_cell_ref[...], wc_ref[...], preferred_element_type=f32)
              + bias_ref[0:1, :])                              # [Nc, 3H]
    proj_d = (jnp.dot(x_drug_ref[...], wd_ref[...], preferred_element_type=f32)
              + bias_ref[1:2, :])                              # [Nd, 3H]

    # ---- LEConv cellline -> drug  (z_drug) ----
    adj_cd = adj_cd_ref[...]                                   # bf16 [Nd, Nc]
    deg_cd = jnp.sum(adj_cd.astype(f32), axis=1, keepdims=True)
    z_drug = (jnp.dot(adj_cd, proj_c[:, 0:H].astype(bf16),
                      preferred_element_type=f32)
              - deg_cd * proj_d[:, H:2 * H]
              + proj_d[:, 2 * H:3 * H])                        # [Nd, H]

    # ---- LEConv drug -> cellline  (z_cell) ----
    adj_dc = adj_dc_ref[...]                                   # bf16 [Nc, Nd]
    deg_dc = jnp.sum(adj_dc.astype(f32), axis=1, keepdims=True)
    z_cell = (jnp.dot(adj_dc, proj_d[:, 0:H].astype(bf16),
                      preferred_element_type=f32)
              - deg_dc * proj_c[:, H:2 * H]
              + proj_c[:, 2 * H:3 * H])                        # [Nc, H]

    # ---- decoder lin1 per node (gather and linear commute) ----
    p_cell = jnp.dot(z_cell, dec_ref[0:H, :], preferred_element_type=f32)    # [Nc, H]
    p_drug = jnp.dot(z_drug, dec_ref[H:2 * H, :], preferred_element_type=f32)  # [Nd, H]

    # ---- gather via in-kernel one-hot (iota == row), exact in f32 ----
    rows = rows_ref[...]                                       # [E_pad, 2] int32
    e_pad = rows.shape[0]
    onehot_c = (jax.lax.broadcasted_iota(jnp.int32, (e_pad, p_cell.shape[0]), 1)
                == rows[:, 0:1]).astype(f32)                   # [E_pad, Nc]
    onehot_d = (jax.lax.broadcasted_iota(jnp.int32, (e_pad, p_drug.shape[0]), 1)
                == rows[:, 1:2]).astype(f32)                   # [E_pad, Nd]
    h = jax.nn.sigmoid(
        jnp.dot(onehot_c, p_cell, preferred_element_type=f32)
        + jnp.dot(onehot_d, p_drug, preferred_element_type=f32)
        + dec_ref[2 * H:2 * H + 1, :])                         # [E_pad, H]

    # final H -> 1 projection as a VPU reduce; lane-dense [1, E_pad] store.
    score = jnp.sum(h * dec_ref[2 * H + 1:2 * H + 2, :], axis=-1)   # [E_pad]
    out_ref[...] = jax.nn.sigmoid(score + b2_ref[0, 0])[None, :]    # [1, E_pad]


# --------------------------- wrapper ------------------------------------------

def _round_up(n, m):
    return ((n + m - 1) // m) * m


def prepare_kernel_args(params, x_dict, adj_dict, edge_label_index):
    """One-time packing / padding (hoisted out of the per-call jitted path)."""
    c2d, d2c, dec = params["conv_c2d"], params["conv_d2c"], params["dec"]
    hidden = dec["w1"].shape[1]
    f32, bf16 = jnp.float32, jnp.bfloat16

    # big matmul operands in bf16 (MXU); f32 accumulation inside the kernel
    x_cell = x_dict["cellline"].astype(bf16)                   # [Nc, Fc]
    x_drug = x_dict["drug"].astype(bf16)                       # [Nd, Fd]
    adj_cd = adj_dict["cell_to_drug"].astype(bf16)             # [Nd, Nc]
    adj_dc = adj_dict["drug_to_cell"].astype(bf16)             # [Nc, Nd]

    # six projection weights fused into two [F, 3H] slabs (shared LHS)
    wc = jnp.concatenate([c2d["w1"], d2c["w2"], d2c["w3"]], axis=1).astype(bf16)
    wd = jnp.concatenate([d2c["w1"], c2d["w2"], c2d["w3"]], axis=1).astype(bf16)
    zero_h = jnp.zeros((1, hidden), f32)
    bias = jnp.concatenate(
        [jnp.concatenate([c2d["b1"], zero_h, d2c["b3"]], axis=1),
         jnp.concatenate([d2c["b1"], zero_h, c2d["b3"]], axis=1)], axis=0)  # [2, 3H]

    # decoder slab: [w1a; w1b; b1; w2_row] -> [2H+2, H]; b2 -> SMEM scalar
    dec_slab = jnp.concatenate(
        [dec["w1"], dec["b1"], dec["w2"].reshape(1, hidden)], axis=0).astype(f32)
    b2 = dec["b2"].reshape(1, 1).astype(f32)

    # edge_label_index -> padded [E_pad, 2] int32 (pad rows gather node 0; sliced off)
    row1, row2 = edge_label_index
    e_lbl = int(row1.shape[0])
    e_pad = _round_up(max(e_lbl, 1), 128)                      # lane-dense output row
    rows = jnp.zeros((e_pad, 2), jnp.int32)
    rows = rows.at[:e_lbl, 0].set(row1.astype(jnp.int32))
    rows = rows.at[:e_lbl, 1].set(row2.astype(jnp.int32))

    args = (x_cell, x_drug, adj_cd, adj_dc, wc, wd, bias, dec_slab, rows, b2)
    return args, e_lbl, e_pad, hidden


def build_forward(args, e_pad, hidden):
    """Build the jitted fused forward for the prepared argument shapes."""
    n_cell, f_cell = args[0].shape
    n_drug, f_drug = args[1].shape

    flops = 2 * (n_cell * f_cell * 3 * hidden
                 + n_drug * f_drug * 3 * hidden
                 + n_drug * n_cell * hidden
                 + n_cell * n_drug * hidden
                 + (n_cell + n_drug) * hidden * hidden
                 + e_pad * (n_cell + n_drug) * hidden
                 + e_pad * hidden)
    bytes_accessed = int(sum(int(np.prod(a.shape)) * a.dtype.itemsize for a in args)
                         + 4 * e_pad)
    cost = pl.CostEstimate(flops=int(flops),
                           transcendentals=int(e_pad * (hidden + 1)),
                           bytes_accessed=bytes_accessed)

    in_specs = ([pl.BlockSpec(memory_space=pltpu.MemorySpace.VMEM)] * 9
                + [pl.BlockSpec(memory_space=pltpu.MemorySpace.SMEM)])  # b2 scalar

    call = pl.pallas_call(
        fused_model_kernel,
        out_shape=jax.ShapeDtypeStruct((1, e_pad), jnp.float32),
        in_specs=in_specs,
        out_specs=pl.BlockSpec(memory_space=pltpu.MemorySpace.VMEM),
        cost_estimate=cost,
        compiler_params=pltpu.CompilerParams(vmem_limit_bytes=32 * 1024 * 1024),
    )
    # TODO(synk): for large graphs, grid-tile the adjacency matmuls (dst-node
    # axis "parallel", src reduction axis last + "arbitrary" with a VMEM f32
    # accumulator and pl.when init/finalize) so the working set fits v7x's
    # 64 MiB VMEM and the parallel axis engages both TensorCores.
    return jax.jit(lambda *a: call(*a))


# --------------------------- params / reference -------------------------------

def init_linear(key, fan_in, fan_out, bias=True):
    k1, k2 = jax.random.split(key)
    bound = 1.0 / np.sqrt(fan_in)
    w = jax.random.uniform(k1, (fan_in, fan_out), jnp.float32, -bound, bound)
    b = (jax.random.uniform(k2, (1, fan_out), jnp.float32, -bound, bound)
         if bias else None)
    return w, b


def init_leconv_params(key, f_src, f_dst, hidden):
    k1, k2, k3 = jax.random.split(key, 3)
    w1, b1 = init_linear(k1, f_src, hidden, bias=True)
    w2, _ = init_linear(k2, f_dst, hidden, bias=False)
    w3, b3 = init_linear(k3, f_dst, hidden, bias=True)
    return {"w1": w1, "b1": b1, "w2": w2, "w3": w3, "b3": b3}


def leconv_ref(x_src, x_dst, adj, p):
    a = x_src @ p["w1"] + p["b1"]
    b = x_dst @ p["w2"]
    deg = adj.sum(axis=1, keepdims=True)
    return adj @ a - deg * b + x_dst @ p["w3"] + p["b3"]


def model_ref(params, x_dict, adj_dict, edge_label_index):
    z_drug = leconv_ref(x_dict["cellline"], x_dict["drug"],
                        adj_dict["cell_to_drug"], params["conv_c2d"])
    z_cell = leconv_ref(x_dict["drug"], x_dict["cellline"],
                        adj_dict["drug_to_cell"], params["conv_d2c"])
    row1, row2 = edge_label_index
    z = np.concatenate([np.asarray(z_cell)[row1], np.asarray(z_drug)[row2]], -1)
    h = 1.0 / (1.0 + np.exp(-(z @ params["dec"]["w1"] + params["dec"]["b1"])))
    o = 1.0 / (1.0 + np.exp(-(h @ params["dec"]["w2"] + params["dec"]["b2"])))
    return o.reshape(-1)


# --------------------------- main ----------------------------------------------

if __name__ == "__main__":
    key = jax.random.PRNGKey(0)
    ks = jax.random.split(key, 10)

    N_CELL, N_DRUG = 16, 10          # node counts
    F_CELL, F_DRUG = 20, 14          # input feature dims (lazy (-1,-1) in torch)
    HIDDEN = 32                      # hidden_channels
    N_EDGES = 48                     # cellline->drug edges (ToUndirected adds reverse)
    N_LABEL = 24                     # edge_label_index columns

    # node features
    x_dict = {
        "cellline": jax.random.normal(ks[0], (N_CELL, F_CELL), jnp.float32),
        "drug": jax.random.normal(ks[1], (N_DRUG, F_DRUG), jnp.float32),
    }

    # cellline->drug edges + weights; ToUndirected gives the reversed edge type
    src_cell = jax.random.randint(ks[2], (N_EDGES,), 0, N_CELL)
    dst_drug = jax.random.randint(ks[3], (N_EDGES,), 0, N_DRUG)
    e_weight = jax.random.uniform(ks[4], (N_EDGES,), jnp.float32, 0.1, 1.0)

    # dense weighted adjacency, [num_dst, num_src]
    adj_c2d = jnp.zeros((N_DRUG, N_CELL), jnp.float32).at[dst_drug, src_cell].add(e_weight)
    adj_d2c = jnp.zeros((N_CELL, N_DRUG), jnp.float32).at[src_cell, dst_drug].add(e_weight)
    adj_dict = {"cell_to_drug": adj_c2d, "drug_to_cell": adj_d2c}

    # edge_label_index: row1 -> cellline ids, row2 -> drug ids
    row1 = jax.random.randint(ks[5], (N_LABEL,), 0, N_CELL)
    row2 = jax.random.randint(ks[6], (N_LABEL,), 0, N_DRUG)
    edge_label_index = (row1, row2)

    # parameters (to_hetero duplicates the LEConv per edge type)
    dec_w1, dec_b1 = init_linear(ks[7], 2 * HIDDEN, HIDDEN, bias=True)
    dec_w2, dec_b2 = init_linear(ks[8], HIDDEN, 1, bias=True)
    params = {
        "conv_c2d": init_leconv_params(ks[9], F_CELL, F_DRUG, HIDDEN),
        "conv_d2c": init_leconv_params(jax.random.fold_in(key, 123),
                                       F_DRUG, F_CELL, HIDDEN),
        "dec": {"w1": dec_w1, "b1": dec_b1, "w2": dec_w2, "b2": dec_b2},
    }

    # one-time packing / padding, then a per-call path that is just the kernel
    kernel_args, e_lbl, e_pad, hidden = prepare_kernel_args(
        params, x_dict, adj_dict, edge_label_index)
    fwd = build_forward(kernel_args, e_pad, hidden)

    out_row = jax.block_until_ready(fwd(*kernel_args))
    out = np.asarray(out_row)[0, :e_lbl]        # matches torch .view(-1)

    # correctness check against pure numpy (f32) reference; bf16 matmul inputs
    # with f32 accumulation -> slightly looser tolerance than pure f32.
    np_params = jax.tree_util.tree_map(np.asarray, params)
    np_x = {k: np.asarray(v) for k, v in x_dict.items()}
    np_adj = {k: np.asarray(v) for k, v in adj_dict.items()}
    ref = model_ref(np_params, np_x, np_adj,
                    (np.asarray(row1), np.asarray(row2)))
    np.testing.assert_allclose(out, ref, rtol=2e-2, atol=2e-2)
    assert out.shape == (N_LABEL,)

    print("KERNEL_OK")
</pallas_src>

<mosaic_0001>
module attributes {stable_mosaic.version = 11 : i64} {
  func.func @fused_model_kernel(%arg0: memref<16x20xbf16, #tpu.memory_space<vmem>>, %arg1: memref<10x14xbf16, #tpu.memory_space<vmem>>, %arg2: memref<10x16xbf16, #tpu.memory_space<vmem>>, %arg3: memref<16x10xbf16, #tpu.memory_space<vmem>>, %arg4: memref<20x96xbf16, #tpu.memory_space<vmem>>, %arg5: memref<14x96xbf16, #tpu.memory_space<vmem>>, %arg6: memref<2x96xf32, #tpu.memory_space<vmem>>, %arg7: memref<66x32xf32, #tpu.memory_space<vmem>>, %arg8: memref<128x2xi32, #tpu.memory_space<vmem>>, %arg9: memref<1x1xf32, #tpu.memory_space<smem>>, %arg10: memref<1x128xf32, #tpu.memory_space<vmem>>) attributes {dimension_semantics = [], scalar_prefetch = 0 : i64, scratch_operands = 0 : i64, tpu.core_type = #tpu.core_type<tc>} {
    %c0 = arith.constant 0 : index
    %c0_0 = arith.constant 0 : index
    %0 = vector.load %arg0[%c0, %c0_0] : memref<16x20xbf16, #tpu.memory_space<vmem>>, vector<16x20xbf16>
    %c0_1 = arith.constant 0 : index
    %c0_2 = arith.constant 0 : index
    %1 = vector.load %arg4[%c0_1, %c0_2] : memref<20x96xbf16, #tpu.memory_space<vmem>>, vector<20x96xbf16>
    %cst = arith.constant dense<0.000000e+00> : vector<16x96xf32>
    %2 = tpu.matmul %0, %1, %cst {dimension_numbers = #tpu.dot_dimension_numbers<[1], [0], [0], [1], [0, 0, 1, 1], [], []>} : vector<16x20xbf16>, vector<20x96xbf16>, vector<16x96xf32> -> vector<16x96xf32>
    %c0_3 = arith.constant 0 : index
    %c0_4 = arith.constant 0 : index
    %3 = vector.load %arg6[%c0_3, %c0_4] : memref<2x96xf32, #tpu.memory_space<vmem>>, vector<1x96xf32>
    %4 = vector.broadcast %3 : vector<1x96xf32> to vector<16x96xf32>
    %5 = arith.addf %2, %4 : vector<16x96xf32>
    %c0_5 = arith.constant 0 : index
    %c0_6 = arith.constant 0 : index
    %6 = vector.load %arg1[%c0_5, %c0_6] : memref<10x14xbf16, #tpu.memory_space<vmem>>, vector<10x14xbf16>
    %c0_7 = arith.constant 0 : index
    %c0_8 = arith.constant 0 : index
    %7 = vector.load %arg5[%c0_7, %c0_8] : memref<14x96xbf16, #tpu.memory_space<vmem>>, vector<14x96xbf16>
    %cst_9 = arith.constant dense<0.000000e+00> : vector<10x96xf32>
    %8 = tpu.matmul %6, %7, %cst_9 {dimension_numbers = #tpu.dot_dimension_numbers<[1], [0], [0], [1], [0, 0, 1, 1], [], []>} : vector<10x14xbf16>, vector<14x96xbf16>, vector<10x96xf32> -> vector<10x96xf32>
    %c1 = arith.constant 1 : index
    %c0_10 = arith.constant 0 : index
    %9 = vector.load %arg6[%c1, %c0_10] : memref<2x96xf32, #tpu.memory_space<vmem>>, vector<1x96xf32>
    %10 = vector.broadcast %9 : vector<1x96xf32> to vector<10x96xf32>
    %11 = arith.addf %8, %10 : vector<10x96xf32>
    %c0_11 = arith.constant 0 : index
    %c0_12 = arith.constant 0 : index
    %12 = vector.load %arg2[%c0_11, %c0_12] : memref<10x16xbf16, #tpu.memory_space<vmem>>, vector<10x16xbf16>
    %13 = arith.extf %12 : vector<10x16xbf16> to vector<10x16xf32>
    %cst_13 = arith.constant dense<0.000000e+00> : vector<10xf32>
    %14 = vector.multi_reduction <add>, %13, %cst_13 [1] : vector<10x16xf32> to vector<10xf32>
    %15 = vector.shape_cast %14 : vector<10xf32> to vector<10x1xf32>
    %16 = vector.extract_strided_slice %5 {offsets = [0, 0], sizes = [16, 32], strides = [1, 1]} : vector<16x96xf32> to vector<16x32xf32>
    %17 = arith.truncf %16 : vector<16x32xf32> to vector<16x32xbf16>
    %cst_14 = arith.constant dense<0.000000e+00> : vector<10x32xf32>
    %18 = tpu.matmul %12, %17, %cst_14 {dimension_numbers = #tpu.dot_dimension_numbers<[1], [0], [0], [1], [0, 0, 1, 1], [], []>} : vector<10x16xbf16>, vector<16x32xbf16>, vector<10x32xf32> -> vector<10x32xf32>
    %19 = vector.extract_strided_slice %11 {offsets = [0, 32], sizes = [10, 32], strides = [1, 1]} : vector<10x96xf32> to vector<10x32xf32>
    %20 = vector.broadcast %15 : vector<10x1xf32> to vector<10x32xf32>
    %21 = arith.mulf %20, %19 : vector<10x32xf32>
    %22 = arith.subf %18, %21 : vector<10x32xf32>
    %23 = vector.extract_strided_slice %11 {offsets = [0, 64], sizes = [10, 32], strides = [1, 1]} : vector<10x96xf32> to vector<10x32xf32>
    %24 = arith.addf %22, %23 : vector<10x32xf32>
    %c0_15 = arith.constant 0 : index
    %c0_16 = arith.constant 0 : index
    %25 = vector.load %arg3[%c0_15, %c0_16] : memref<16x10xbf16, #tpu.memory_space<vmem>>, vector<16x10xbf16>
    %26 = arith.extf %25 : vector<16x10xbf16> to vector<16x10xf32>
    %cst_17 = arith.constant dense<0.000000e+00> : vector<16xf32>
    %27 = vector.multi_reduction <add>, %26, %cst_17 [1] : vector<16x10xf32> to vector<16xf32>
    %28 = vector.shape_cast %27 : vector<16xf32> to vector<16x1xf32>
    %29 = vector.extract_strided_slice %11 {offsets = [0, 0], sizes = [10, 32], strides = [1, 1]} : vector<10x96xf32> to vector<10x32xf32>
    %30 = arith.truncf %29 : vector<10x32xf32> to vector<10x32xbf16>
    %cst_18 = arith.constant dense<0.000000e+00> : vector<16x32xf32>
    %31 = tpu.matmul %25, %30, %cst_18 {dimension_numbers = #tpu.dot_dimension_numbers<[1], [0], [0], [1], [0, 0, 1, 1], [], []>} : vector<16x10xbf16>, vector<10x32xbf16>, vector<16x32xf32> -> vector<16x32xf32>
    %32 = vector.extract_strided_slice %5 {offsets = [0, 32], sizes = [16, 32], strides = [1, 1]} : vector<16x96xf32> to vector<16x32xf32>
    %33 = vector.broadcast %28 : vector<16x1xf32> to vector<16x32xf32>
    %34 = arith.mulf %33, %32 : vector<16x32xf32>
    %35 = arith.subf %31, %34 : vector<16x32xf32>
    %36 = vector.extract_strided_slice %5 {offsets = [0, 64], sizes = [16, 32], strides = [1, 1]} : vector<16x96xf32> to vector<16x32xf32>
    %37 = arith.addf %35, %36 : vector<16x32xf32>
    %c0_19 = arith.constant 0 : index
    %c0_20 = arith.constant 0 : index
    %38 = vector.load %arg7[%c0_19, %c0_20] : memref<66x32xf32, #tpu.memory_space<vmem>>, vector<32x32xf32>
    %cst_21 = arith.constant dense<0.000000e+00> : vector<16x32xf32>
    %39 = tpu.matmul %37, %38, %cst_21 {dimension_numbers = #tpu.dot_dimension_numbers<[1], [0], [0], [1], [0, 0, 1, 1], [], []>} : vector<16x32xf32>, vector<32x32xf32>, vector<16x32xf32> -> vector<16x32xf32>
    %c32 = arith.constant 32 : index
    %c0_22 = arith.constant 0 : index
    %40 = vector.load %arg7[%c32, %c0_22] : memref<66x32xf32, #tpu.memory_space<vmem>>, vector<32x32xf32>
    %cst_23 = arith.constant dense<0.000000e+00> : vector<10x32xf32>
    %41 = tpu.matmul %24, %40, %cst_23 {dimension_numbers = #tpu.dot_dimension_numbers<[1], [0], [0], [1], [0, 0, 1, 1], [], []>} : vector<10x32xf32>, vector<32x32xf32>, vector<10x32xf32> -> vector<10x32xf32>
    %c0_24 = arith.constant 0 : index
    %c0_25 = arith.constant 0 : index
    %42 = vector.load %arg8[%c0_24, %c0_25] : memref<128x2xi32, #tpu.memory_space<vmem>>, vector<128x2xi32>
    %43 = tpu.iota {dimensions = array<i32: 1>} : vector<128x16xi32>
    %44 = vector.extract_strided_slice %42 {offsets = [0, 0], sizes = [128, 1], strides = [1, 1]} : vector<128x2xi32> to vector<128x1xi32>
    %45 = vector.broadcast %44 : vector<128x1xi32> to vector<128x16xi32>
    %46 = arith.cmpi eq, %43, %45 : vector<128x16xi32>
    %47 = arith.extui %46 : vector<128x16xi1> to vector<128x16xi32>
    %48 = arith.sitofp %47 : vector<128x16xi32> to vector<128x16xf32>
    %49 = tpu.iota {dimensions = array<i32: 1>} : vector<128x10xi32>
    %50 = vector.extract_strided_slice %42 {offsets = [0, 1], sizes = [128, 1], strides = [1, 1]} : vector<128x2xi32> to vector<128x1xi32>
    %51 = vector.broadcast %50 : vector<128x1xi32> to vector<128x10xi32>
    %52 = arith.cmpi eq, %49, %51 : vector<128x10xi32>
    %53 = arith.extui %52 : vector<128x10xi1> to vector<128x10xi32>
    %54 = arith.sitofp %53 : vector<128x10xi32> to vector<128x10xf32>
    %cst_26 = arith.constant dense<0.000000e+00> : vector<128x32xf32>
    %55 = tpu.matmul %48, %39, %cst_26 {dimension_numbers = #tpu.dot_dimension_numbers<[1], [0], [0], [1], [0, 0, 1, 1], [], []>} : vector<128x16xf32>, vector<16x32xf32>, vector<128x32xf32> -> vector<128x32xf32>
    %cst_27 = arith.constant dense<0.000000e+00> : vector<128x32xf32>
    %56 = tpu.matmul %54, %41, %cst_27 {dimension_numbers = #tpu.dot_dimension_numbers<[1], [0], [0], [1], [0, 0, 1, 1], [], []>} : vector<128x10xf32>, vector<10x32xf32>, vector<128x32xf32> -> vector<128x32xf32>
    %57 = arith.addf %55, %56 : vector<128x32xf32>
    %c64 = arith.constant 64 : index
    %c0_28 = arith.constant 0 : index
    %58 = vector.load %arg7[%c64, %c0_28] : memref<66x32xf32, #tpu.memory_space<vmem>>, vector<1x32xf32>
    %59 = vector.broadcast %58 : vector<1x32xf32> to vector<128x32xf32>
    %60 = arith.addf %57, %59 : vector<128x32xf32>
    %61 = arith.negf %60 : vector<128x32xf32>
    %62 = math.exp %61 : vector<128x32xf32>
    %cst_29 = arith.constant 1.000000e+00 : f32
    %63 = vector.broadcast %cst_29 : f32 to vector<128x32xf32>
    %64 = arith.addf %63, %62 : vector<128x32xf32>
    %65 = arith.divf %63, %64 : vector<128x32xf32>
    %c65 = arith.constant 65 : index
    %c0_30 = arith.constant 0 : index
    %66 = vector.load %arg7[%c65, %c0_30] : memref<66x32xf32, #tpu.memory_space<vmem>>, vector<1x32xf32>
    %67 = vector.broadcast %66 : vector<1x32xf32> to vector<128x32xf32>
    %68 = arith.mulf %65, %67 : vector<128x32xf32>
    %cst_31 = arith.constant dense<0.000000e+00> : vector<128xf32>
    %69 = vector.multi_reduction <add>, %68, %cst_31 [1] : vector<128x32xf32> to vector<128xf32>
    %c0_32 = arith.constant 0 : index
    %c0_33 = arith.constant 0 : index
    %70 = memref.load %arg9[%c0_32, %c0_33] : memref<1x1xf32, #tpu.memory_space<smem>>
    %71 = vector.broadcast %70 : f32 to vector<128xf32>
    %72 = arith.addf %69, %71 : vector<128xf32>
    %73 = arith.negf %72 : vector<128xf32>
    %74 = math.exp %73 : vector<128xf32>
    %cst_34 = arith.constant 1.000000e+00 : f32
    %75 = vector.broadcast %cst_34 : f32 to vector<128xf32>
    %76 = arith.addf %75, %74 : vector<128xf32>
    %77 = arith.divf %75, %76 : vector<128xf32>
    %78 = vector.shape_cast %77 : vector<128xf32> to vector<1x128xf32>
    %c0_35 = arith.constant 0 : index
    %c0_36 = arith.constant 0 : index
    %79 = vector.load %arg10[%c0_35, %c0_36] : memref<1x128xf32, #tpu.memory_space<vmem>>, vector<1x128xf32>
    tpu.vector_store %arg10[%c0_35, %c0_36], %78 {strides = array<i32>} : memref<1x128xf32, #tpu.memory_space<vmem>>, vector<1x128xf32>,
    return
  }
}

</mosaic_0001>

<bundles_post_ra>
// kernel: _lambda_.1
= control target key start
LH: loop header
LB: loop body
LE: loop exit
PB: predicated region body
PF: predicated region fallthrough
CT: control target
= control target key end

     0   :  { %v2019_v1 = vmov 0.0   ;;  %vm66_vm0 = vcmask 1041408   ;;  %vm134_vm1 = vcmask 1046528   ;;  %vm2020_vm2 = vmmov 0   ;;  %s2471_s0 = inlined_call_operand.vmem [shape: bf16[16,20], index: 0, kind: input, shape index: {}]   ;;  %s2472_s1 = inlined_call_operand.vmem [shape: bf16[10,14], index: 1, kind: input, shape index: {}]   ;;  %s2473_s2 = inlined_call_operand.vmem [shape: bf16[10,16], index: 2, kind: input, shape index: {}]   ;;  %s2474_s3 = inlined_call_operand.vmem [shape: bf16[16,10], index: 3, kind: input, shape index: {}]   ;;  %s2475_s4 = inlined_call_operand.vmem [shape: bf16[20,96], index: 4, kind: input, shape index: {}]   ;;  %s2476_s5 = inlined_call_operand.vmem [shape: bf16[14,96], index: 5, kind: input, shape index: {}]   ;;  %s2477_s6 = inlined_call_operand.vmem [shape: f32[2,96], index: 6, kind: input, shape index: {}]   ;;  %s2478_s7 = inlined_call_operand.vmem [shape: f32[66,32], index: 7, kind: input, shape index: {}]   ;;  %s2479_s8 = inlined_call_operand.vmem [shape: s32[128,2], index: 8, kind: input, shape index: {}]   ;;  %s2480_s9 = inlined_call_operand.<no memory space> [shape: f32[1,1], index: 9, kind: input, shape index: {}]   ;;  %s2481_s10 = inlined_call_operand.hbm [shape: f32[1,128], index: 10, kind: output, shape index: {}]  }
   0x1   :  { %v1861_v0 = vld [vmem:[%s2475_s4 + $0x8] ss:$0 sps:$4 sm:$0x33]   ;;  %1734 = vmatprep.subr.bf16.mxu0 %v2019_v1  ;;  %1742 = vmatprep.subr.bf16.mxu1 %v2019_v1  ;;  %v1862_v3 = vld [vmem:[%s2476_s5] sm:$0x7f]   ;;  %vm130_vm3 = vcmask 113664  }
   0x2   :  { %v68_v2 = vsel %vm66_vm0, %v1861_v0, 0  ;;  %1744 = vmatprep.mubr.msk.bf16.mxu1 %vm2020_vm2, %v2019_v1  ;;  %v1863_v4 = vld [vmem:[%s2472_s1] sm:$0x1f]   ;;  %v136_v6 = vsel %vm134_vm1, %v1862_v3, 0  ;;  %1738 = vmatprep.mubr.msk.bf16.mxu0 %vm2020_vm2, %v2019_v1  ;;  %vm62_vm4 = vcmask 162816   ;;  %vm183_vm5 = vcmask 130048  }
   0x3   :  { %1735 = vmatpush3.bf16.msra.mxu0 %v68_v2  ;;  %v1864_v5 = vld [vmem:[%s2475_s4] sm:$0xff]   ;;  %1743 = vmatpush3.bf16.msra.mxu1 %v136_v6  ;;  %vm187_vm6 = vcmask 123904  }
   0x4   :  { %1736 = vmatprep.subr.bf16.mxu0 %v2019_v1  ;;  %v1865_v7 = vld [vmem:[%s2471_s0] sm:$0xff]   ;;  %1748 = vmatprep.subr.bf16.mxu1 %v2019_v1 }
   0x5   :  { %v2107_v8 = vld [vmem:[%s2473_s2] sm:$0xf]  ;;  %v180_v9 = vld [vmem:[%s2473_s2 + $0x4] sm:$0x1] }
   0x6   :  { %v263_v10 = vld [vmem:[%s2474_s3] sm:$0xff]   ;;  %v181_v11 = vunpack.c.l.bf16 %v2107_v8  ;;  %v182_v12 = vunpack.c.l.bf16 %v180_v9  ;;  %v1570_v13 = vcombine.low %v2107_v8, %v180_v9 }
   0x7   :  { %1737 = vmatpush3.bf16.msra.mxu0 %v1864_v5  ;;  %v265_v14 = vunpack.c.l.bf16 %v263_v10 }
   0x8   :  { %16 = vsyncpa [#allocation4], 0  ;;  %1745 = vmatmul.mubr.msk.bf16.vlgmr.msra.gmra.mxu1 %vm130_vm3, %v1863_v4  ;;  %vm267_vm7 = vcmask 80896   ;;  %v266_v15 = vunpack.c.h.bf16 %v263_v10  ;;  %1754 = vmatprep.subr.bf16.mxu0 %v2019_v1  ;;  %v184_v16 = vsel %vm183_vm5, %v181_v11, 0.0  ;;  %v188_v17 = vsel %vm187_vm6, %v182_v12, 0.0  ;;  %s2021_s27 = smov 64  }
   0x9   :  { %1750 = vmatprep.mubr.msk.bf16.mxu1 %vm2020_vm2, %v2019_v1  ;;  %185 = vadd.xlane.f32.xlu0 %v184_v16  ;;  %v268_v18 = vsel %vm267_vm7, %v265_v14, 0.0  ;;  %v1566_v21 = vld [vmem:[%s2477_s6 + $0x1] ss:$0 sm:$0xff]  ;;  %v1561_v23 = vld [vmem:[%s2477_s6] ss:$0 sm:$0xff]  ;;  %vm283_vm8 = vcmask 1044480  }
   0xa   :  { %1739 = vmatmul.mubr.msk.bf16.vlgmr.msra.gmra.mxu0 %vm62_vm4, %v1865_v7  ;;  %189 = vadd.xlane.f32.xlu1 %v188_v17  ;;  %v271_v19 = vsel %vm267_vm7, %v266_v15, 0.0  ;;  %s2022_s6 = smov 96   ;;  %v353_v45 = vld [vmem:[%s2478_s7 + $0x18] sm:$0xff]  ;;  %v352_v46 = vld [vmem:[%s2478_s7 + $0x10] sm:$0xff]  ;;  %v351_v48 = vld [vmem:[%s2478_s7 + $0x8] sm:$0xff]  ;;  %v2023_v54 = vmov 1   ;;  %v537_v15 = vlaneseq }
   0xb   :  { %1756 = vmatprep.mubr.msk.bf16.mxu0 %vm2020_vm2, %v2019_v1  ;;  %v439_v47 = vld [vmem:[%s2478_s7 + $0x38] sm:$0xff]  ;;  %v438_v49 = vld [vmem:[%s2478_s7 + $0x30] sm:$0xff]  ;;  %v350_v50 = vld [vmem:[%s2478_s7] sm:$0xff]  ;;  %1845 = vset.pattern.permute.xlu1 %v2023_v54  ;;  %v2024_v56 = vmov 0   ;;  %vm354_vm9 = vcmask 261120  }
   0xc   :  { %v437_v51 = vld [vmem:[%s2478_s7 + $0x28] sm:$0xff]  ;;  %v436_v52 = vld [vmem:[%s2478_s7 + $0x20] sm:$0xff]  ;;  %1847 = vset.pattern.permute.xlu0 %v2023_v54  ;;  %v523_v58 = vld [vmem:[%s2479_s8 + $0x10] sm:$0xff] }
   0xd   :  { %269 = vadd.xlane.f32.xlu0 %v268_v18  ;;  %v521_v53 = vld [vmem:[%s2479_s8] sm:$0xff]  ;;  %v522_v55 = vld [vmem:[%s2479_s8 + $0x8] sm:$0xff]  ;;  %v524_v59 = vld [vmem:[%s2479_s8 + $0x18] sm:$0xff] }
   0xe   :  { %272 = vadd.xlane.f32.xlu1 %v271_v19  ;;  %v525_v57 = vld [vmem:[%s2479_s8 + $0x20] sm:$0xff]  ;;  %v527_v60 = vld [vmem:[%s2479_s8 + $0x30] sm:$0xff]  ;;  %v530_v61 = vld [vmem:[%s2479_s8 + $0x48] sm:$0xff] }
   0xf   :  { %v533_v62 = vld [vmem:[%s2479_s8 + $0x60] sm:$0xff]  ;;  %v526_v63 = vld [vmem:[%s2479_s8 + $0x28] sm:$0xff]  ;;  %v528_v0 = vld [vmem:[%s2479_s8 + $0x38] sm:$0xff] }
  0x10   :  { %v531_v2 = vld [vmem:[%s2479_s8 + $0x50] sm:$0xff]  ;;  %v534_v3 = vld [vmem:[%s2479_s8 + $0x68] sm:$0xff]  ;;  %v529_v4 = vld [vmem:[%s2479_s8 + $0x40] sm:$0xff] }
  0x11   :  { %v536_v5 = vld [vmem:[%s2479_s8 + $0x78] sm:$0xff]  ;;  %v535_v7 = vld [vmem:[%s2479_s8 + $0x70] sm:$0xff] }
  0x12   :  { %v532_v6 = vld [vmem:[%s2479_s8 + $0x58] sm:$0xff] }
  0x92   :  { %v186_v20 = vpop.xlane.xlu0 %185 }
  0x93   :  { %v190_v33 = vpop.xlane.xlu1 %189 }
  0x96   :  { %v270_v29 = vpop.xlane.xlu0 %269 }
  0x97   :  { %v273_v43 = vpop.xlane.xlu1 %272 }
  0xc8   :  { %v172_v22 = vpop.f32.mrf.mxu1 }
  0xc9   :  { %v173_v24 = vadd.f32 %v1566_v21, %v172_v22 }
  0xca   :  { %v1746_v25 = vpop.f32.mrf.mxu1  ;;  %v104_v26 = vpop.f32.mrf.mxu0 }
  0xcb   :  { %v241_v27 = vmul.f32 %v186_v20, %v173_v24  ;;  %255 = vrot.lane.b32.xlu0 %v173_v24, %s2021_s27  ;;  %v105_v28 = vadd.f32 %v1561_v23, %v104_v26  ;;  %v2213_v26 = vand.u32 127, %v537_v15 }
  0xcc   :  { %v175_v30 = vpop.f32.mrf.mxu1  ;;  %v1740_v31 = vpop.f32.mrf.mxu0 }
  0xcd   :  { %v176_v32 = vadd.f32 %v1566_v21, %v175_v30  ;;  %342 = vrot.lane.b32.xlu1 %v105_v28, %s2021_s27  ;;  %v328_v37 = vmul.f32 %v270_v29, %v105_v28 }
  0xce   :  { %v1747_v34 = vpop.f32.mrf.mxu1  ;;  %v107_v35 = vpop.f32.mrf.mxu0 }
  0xcf   :  { %v274_v36 = vpack.c.bf16 %v176_v32, %v173_v24  ;;  %245 = vrot.lane.b32.xlu0 %v241_v27, %s2022_s6  ;;  %v108_v38 = vadd.f32 %v1561_v23, %v107_v35  ;;  %v242_v42 = vmul.f32 %v190_v33, %v176_v32 }
  0xd0   :  { %v1741_v39 = vpop.f32.mrf.mxu0 }
  0xd1   :  { %v191_v40 = vpack.c.bf16 %v108_v38, %v105_v28  ;;  %v285_v41 = vsel %vm283_vm8, %v274_v36, 0  ;;  %332 = vrot.lane.b32.xlu1 %v328_v37, %s2022_s6  ;;  %v329_v44 = vmul.f32 %v273_v43, %v108_v38 }
  0xd2   :  { %1755 = vmatpush3.bf16.msra.mxu0 %v285_v41 }
  0xd3   :  { %257 = vrot.lane.b32.xlu0 %v176_v32, %s2021_s27  ;;  %1749 = vmatpush3.bf16.msra.mxu1 %v191_v40 }
  0xd4   :  { %1760 = vmatprep.subr.mxu1 %v353_v45  ;;  %1771 = vmatprep.subr.mxu0 %v439_v47 }
  0xd5   :  { %1757 = vmatmul.mubr.msk.bf16.vlgmr.msra.gmra.mxu0 %vm267_vm7, %v263_v10  ;;  %247 = vrot.lane.b32.xlu1 %v242_v42, %s2022_s6 }
  0xd6   :  { %1751 = vmatmul.mubr.msk.bf16.vlgmr.msra.gmra.mxu1 %vm183_vm5, %v1570_v13  ;;  %1772 = vmatpush3.msra.mxu0 %v439_v47 }
  0xd7   :  { %1761 = vmatpush3.msra.mxu1 %v353_v45  ;;  %1773 = vmatprep.subr.mxu0 %v438_v49 }
  0xd8   :  { %1762 = vmatprep.subr.mxu1 %v352_v46  ;;  %1774 = vmatpush3.msra.mxu0 %v438_v49 }
  0xd9   :  { %334 = vrot.lane.b32.xlu1 %v329_v44, %s2022_s6  ;;  %1763 = vmatpush3.msra.mxu1 %v352_v46 }
  0xda   :  { %1764 = vmatprep.subr.mxu1 %v351_v48  ;;  %1775 = vmatprep.subr.mxu0 %v437_v51 }
  0xdb   :  { %1765 = vmatpush3.msra.mxu1 %v351_v48  ;;  %1776 = vmatpush3.msra.mxu0 %v437_v51 }
  0xdc   :  { %1766 = vmatprep.subr.mxu1 %v350_v50  ;;  %1777 = vmatprep.subr.mxu0 %v436_v52 }
  0xdd   :  { %344 = vrot.lane.b32.xlu1 %v108_v38, %s2021_s27  ;;  %1767 = vmatpush3.msra.mxu1 %v350_v50 }
  0xde   :  { %1778 = vmatpush3.msra.mxu0 %v436_v52  ;;  %639 = vperm.xlu0 %1847, %v522_v55  }
  0xe1   :  { %636 = vperm.xlu1 %1845, %v521_v53  }
  0xe2   :  { %648 = vperm.xlu0 %1847, %v525_v57  }
  0xe5   :  { %1846 = vset.pattern.permute.xlu1 %v2024_v56 }
  0xe6   :  { %543 = vperm.xlu1 %1846, %v522_v55   ;;  %1850 = vset.pattern.permute.xlu0 %v2024_v56 }
  0xe7   :  { %540 = vperm.xlu0 %1850, %v521_v53  }
  0xea   :  { %546 = vperm.xlu1 %1846, %v523_v58  }
  0xeb   :  { %549 = vperm.xlu0 %1850, %v524_v59  }
  0xee   :  { %1848 = vset.pattern.permute.xlu1 %v2023_v54 }
  0xef   :  { %642 = vperm.xlu1 %1848, %v523_v58   ;;  %558 = vperm.xlu0 %1850, %v527_v60  }
  0xf3   :  { %645 = vperm.xlu1 %1848, %v524_v59   ;;  %567 = vperm.xlu0 %1850, %v530_v61  }
  0xf7   :  { %1849 = vset.pattern.permute.xlu1 %v2024_v56  ;;  %576 = vperm.xlu0 %1850, %v533_v62  }
  0xf8   :  { %552 = vperm.xlu1 %1849, %v525_v57  }
  0xfb   :  { %1856 = vset.pattern.permute.xlu0 %v2023_v54 }
  0xfc   :  { %555 = vperm.xlu1 %1849, %v526_v63   ;;  %657 = vperm.xlu0 %1856, %v528_v0  }
 0x100   :  { %1851 = vset.pattern.permute.xlu1 %v2023_v54  ;;  %666 = vperm.xlu0 %1856, %v531_v2  }
 0x101   :  { %651 = vperm.xlu1 %1851, %v526_v63  }
 0x104   :  { %675 = vperm.xlu0 %1856, %v534_v3  }
 0x105   :  { %654 = vperm.xlu1 %1851, %v527_v60  }
 0x108   :  { %1859 = vset.pattern.permute.xlu0 %v2024_v56 }
 0x109   :  { %1852 = vset.pattern.permute.xlu1 %v2024_v56  ;;  %585 = vperm.xlu0 %1859, %v536_v5  }
 0x10a   :  { %561 = vperm.xlu1 %1852, %v528_v0  }
 0x10d   :  { %1860 = vset.pattern.permute.xlu0 %v2023_v54 }
 0x10e   :  { %564 = vperm.xlu1 %1852, %v529_v4  }
 0x112   :  { %1853 = vset.pattern.permute.xlu1 %v2023_v54 }
 0x113   :  { %660 = vperm.xlu1 %1853, %v529_v4  }
 0x117   :  { %663 = vperm.xlu1 %1853, %v530_v61  }
 0x11b   :  { %1854 = vset.pattern.permute.xlu1 %v2024_v56 }
 0x11c   :  { %570 = vperm.xlu1 %1854, %v531_v2  }
 0x120   :  { %573 = vperm.xlu1 %1854, %v532_v6  }
 0x124   :  { %1855 = vset.pattern.permute.xlu1 %v2023_v54 }
 0x125   :  { %669 = vperm.xlu1 %1855, %v532_v6  }
 0x129   :  { %672 = vperm.xlu1 %1855, %v533_v62  }
 0x12d   :  { %1857 = vset.pattern.permute.xlu1 %v2024_v56 }
 0x12e   :  { %579 = vperm.xlu1 %1857, %v534_v3  }
 0x132   :  { %582 = vperm.xlu1 %1857, %v535_v7  }
 0x136   :  { %1858 = vset.pattern.permute.xlu1 %v2023_v54 }
 0x137   :  { %678 = vperm.xlu1 %1858, %v535_v7  }
 0x13b   :  { %681 = vperm.xlu1 %1858, %v536_v5  }
 0x13d   :  { %v256_v11 = vpop.permute.xlu0 %255 }
 0x13f   :  { %v343_v8 = vpop.permute.xlu1 %342 }
 0x141   :  { %v246_v13 = vpop.permute.xlu0 %245 }
 0x143   :  { %v333_v9 = vpop.permute.xlu1 %332 }
 0x145   :  { %v258_v23 = vpop.permute.xlu0 %257 }
 0x147   :  { %v248_v10 = vpop.permute.xlu1 %247 }
 0x14b   :  { %v335_v12 = vpop.permute.xlu1 %334 }
 0x14f   :  { %v345_v20 = vpop.permute.xlu1 %344 }
 0x159   :  { %v640_v35 = vpop.permute.xlu0 %639 }
 0x15a   :  { %vm684_vm14 = vcmp.eq.s32.totalorder %v2213_v26, %v640_v35 }
 0x15b   :  { %v1595_v3 = vsel %vm684_vm14, 1.0, %v2019_v1 }
 0x15c   :  { %v637_v33 = vpop.permute.xlu1 %636 }
 0x15d   :  { %vm683_vm10 = vcmp.eq.s32.totalorder %v2213_v26, %v637_v33  ;;  %v649_v37 = vpop.permute.xlu0 %648 }
 0x15e   :  { %v1594_v36 = vsel %vm683_vm10, 1.0, %v2019_v1  ;;  %vm687_vm3 = vcmp.eq.s32.totalorder %v2213_v26, %v649_v37 }
 0x161   :  { %v544_v40 = vpop.permute.xlu1 %543 }
 0x162   :  { %v541_v38 = vpop.permute.xlu0 %540  ;;  %vm588_vm12 = vcmp.eq.s32.totalorder %v2213_v26, %v544_v40 }
 0x163   :  { %vm587_vm11 = vcmp.eq.s32.totalorder %v2213_v26, %v541_v38  ;;  %v1579_v63 = vsel %vm588_vm12, 1.0, %v2019_v1 }
 0x164   :  { %v1578_v39 = vsel %vm587_vm11, 1.0, %v2019_v1 }
 0x165   :  { %v547_v41 = vpop.permute.xlu1 %546 }
 0x166   :  { %v550_v53 = vpop.permute.xlu0 %549  ;;  %vm589_vm13 = vcmp.eq.s32.totalorder %v2213_v26, %v547_v41 }
 0x167   :  { %v1580_v2 = vsel %vm589_vm13, 1.0, %v2019_v1  ;;  %vm590_vm1 = vcmp.eq.s32.totalorder %v2213_v26, %v550_v53 }
 0x168   :  { %v1581_v5 = vsel %vm590_vm1, 1.0, %v2019_v1 }
 0x16a   :  { %v643_v42 = vpop.permute.xlu1 %642  ;;  %v559_v55 = vpop.permute.xlu0 %558 }
 0x16b   :  { %vm685_vm15 = vcmp.eq.s32.totalorder %v2213_v26, %v643_v42  ;;  %vm593_vm8 = vcmp.eq.s32.totalorder %v2213_v26, %v559_v55 }
 0x16c   :  { %v1596_v4 = vsel %vm685_vm15, 1.0, %v2019_v1 }
 0x16e   :  { %v646_v43 = vpop.permute.xlu1 %645  ;;  %v2239_v57 = vpop.permute.xlu0 %567 }
 0x16f   :  { %vm596_vm15 = vcmp.eq.s32.totalorder %v2213_v26, %v2239_v57 }
 0x172   :  { %v2250_v0 = vpop.permute.xlu0 %576 }
 0x173   :  { %v553_v44 = vpop.permute.xlu1 %552 }
 0x174   :  { %vm591_vm2 = vcmp.eq.s32.totalorder %v2213_v26, %v553_v44 }
 0x177   :  { %v556_v45 = vpop.permute.xlu1 %555  ;;  %v658_v6 = vpop.permute.xlu0 %657 }
 0x178   :  { %vm592_vm4 = vcmp.eq.s32.totalorder %v2213_v26, %v556_v45  ;;  %vm690_vm11 = vcmp.eq.s32.totalorder %v2213_v26, %v658_v6 }
 0x17c   :  { %v652_v46 = vpop.permute.xlu1 %651 }
 0x17d   :  { %vm688_vm6 = vcmp.eq.s32.totalorder %v2213_v26, %v652_v46 }
 0x180   :  { %v655_v47 = vpop.permute.xlu1 %654 }
 0x181   :  { %vm689_vm10 = vcmp.eq.s32.totalorder %v2213_v26, %v655_v47 }
 0x185   :  { %v2225_v48 = vpop.permute.xlu1 %561 }
 0x186   :  { %vm594_vm12 = vcmp.eq.s32.totalorder %v2213_v26, %v2225_v48 }
 0x189   :  { %v2227_v49 = vpop.permute.xlu1 %564 }
 0x18a   :  { %vm595_vm13 = vcmp.eq.s32.totalorder %v2213_v26, %v2227_v49 }
 0x18e   :  { %v2229_v50 = vpop.permute.xlu1 %660 }
 0x18f   :  { %vm691_vm14 = vcmp.eq.s32.totalorder %v2213_v26, %v2229_v50 }
 0x192   :  { %v2231_v51 = vpop.permute.xlu1 %663 }
 0x193   :  { %vm692_vm1 = vcmp.eq.s32.totalorder %v2213_v26, %v2231_v51 }
 0x195   :  { %v321_v14 = vpop.f32.mrf.mxu0 }
 0x196   :  { %v338_v16 = vsub.f32 %v321_v14, %v333_v9  ;;  %v234_v17 = vpop.f32.mrf.mxu1  ;;  %v1600_v14 = vsel %vm689_vm10, 1.0, %v2019_v1 }
 0x197   :  { %v1758_v18 = vpop.f32.mrf.mxu0  ;;  %v251_v19 = vsub.f32 %v234_v17, %v246_v13  ;;  %v2233_v52 = vpop.permute.xlu1 %570  ;;  %v1584_v13 = vsel %vm593_vm8, 1.0, %v2019_v1  ;;  %v1601_v17 = vsel %vm690_vm11, 1.0, %v2019_v1 }
 0x198   :  { %v348_v21 = vadd.f32 %v343_v8, %v338_v16  ;;  %v1752_v22 = vpop.f32.mrf.mxu1  ;;  %v1582_v8 = vsel %vm591_vm2, 1.0, %v2019_v1  ;;  %v667_v16 = vpop.permute.xlu0 %666 }
 0x199   :  { %v261_v24 = vadd.f32 %v256_v11, %v251_v19  ;;  %v324_v25 = vpop.f32.mrf.mxu0  ;;  %v1583_v11 = vsel %vm592_vm4, 1.0, %v2019_v1  ;;  %v1585_v19 = vsel %vm594_vm12, 1.0, %v2019_v1  ;;  %vm693_vm2 = vcmp.eq.s32.totalorder %v2213_v26, %v667_v16 }
 0x19a   :  { %v339_v27 = vsub.f32 %v324_v25, %v335_v12  ;;  %1768 = vmatprep.mubr.msk.f32.mxu1 %vm354_vm9, %v348_v21  ;;  %v237_v28 = vpop.f32.mrf.mxu1  ;;  %v1599_v12 = vsel %vm688_vm6, 1.0, %v2019_v1  ;;  %v1602_v21 = vsel %vm691_vm14, 1.0, %v2019_v1  ;;  %v1587_v22 = vsel %vm596_vm15, 1.0, %v2019_v1 }
 0x19b   :  { %v252_v29 = vsub.f32 %v237_v28, %v248_v10  ;;  %v1759_v30 = vpop.f32.mrf.mxu0  ;;  %1779 = vmatprep.mubr.msk.f32.mxu0 %vm354_vm9, %v261_v24  ;;  %v2235_v54 = vpop.permute.xlu1 %573  ;;  %v1598_v10 = vsel %vm687_vm3, 1.0, %v2019_v1  ;;  %v1603_v24 = vsel %vm692_vm1, 1.0, %v2019_v1  ;;  %vm599_vm4 = vcmp.eq.s32.totalorder %v2213_v26, %v2250_v0 }
 0x19c   :  { %v349_v31 = vadd.f32 %v345_v20, %v339_v27  ;;  %v1753_v32 = vpop.f32.mrf.mxu1  ;;  %v1586_v20 = vsel %vm595_vm13, 1.0, %v2019_v1  ;;  %vm598_vm3 = vcmp.eq.s32.totalorder %v2213_v26, %v2235_v54  ;;  %v1604_v28 = vsel %vm693_vm2, 1.0, %v2019_v1 }
 0x19d   :  { %v262_v34 = vadd.f32 %v258_v23, %v252_v29  ;;  %v676_v23 = vpop.permute.xlu0 %675  ;;  %v1589_v29 = vsel %vm598_vm3, 1.0, %v2019_v1  ;;  %vm1466_vm1 = vcmask 326912   ;;  %vm1480_vm2 = vcmask 458112  }
 0x19e   :  { %1769 = vmatmul.mubr.msk.f32.vlgmr.msra.gmra.mxu1 %vm354_vm9, %v349_v31  ;;  %v1590_v31 = vsel %vm599_vm4, 1.0, %v2019_v1  ;;  %vm696_vm12 = vcmp.eq.s32.totalorder %v2213_v26, %v676_v23  ;;  %vm1487_vm3 = vcmask 523712   ;;  %vm1494_vm4 = vcmask 589312  }
 0x19f   :  { %1780 = vmatmul.mubr.msk.f32.vlgmr.msra.gmra.mxu0 %vm354_vm9, %v262_v34  ;;  %1786 = vmatprep.mubr.msk.f32.mxu1 %vm267_vm7, %v1594_v36  ;;  %v1607_v37 = vsel %vm696_vm12, 1.0, %v2019_v1  ;;  %vm1529_vm12 = vcmask 917312  }
 0x1a0   :  { %1814 = vmatprep.mubr.msk.f32.mxu0 %vm183_vm5, %v1578_v39  ;;  %v2237_v56 = vpop.permute.xlu1 %669 }
 0x1a1   :  { %vm694_vm6 = vcmp.eq.s32.totalorder %v2213_v26, %v2237_v56  ;;  %v586_v30 = vpop.permute.xlu0 %585 }
 0x1a2   :  { %v1605_v32 = vsel %vm694_vm6, 1.0, %v2019_v1  ;;  %vm602_vm14 = vcmp.eq.s32.totalorder %v2213_v26, %v586_v30  ;;  %vm1501_vm6 = vcmask 654912  }
 0x1a3   :  { %v1593_v39 = vsel %vm602_vm14, 1.0, %v2019_v1  ;;  %vm1543_vm14 = vcmask 1048512  }
 0x1a4   :  { %v2247_v62 = vpop.permute.xlu1 %672 }
 0x1a5   :  { %vm695_vm8 = vcmp.eq.s32.totalorder %v2213_v26, %v2247_v62 }
 0x1a6   :  { %v1606_v33 = vsel %vm695_vm8, 1.0, %v2019_v1  ;;  %vm1508_vm8 = vcmask 720512  }
 0x1a9   :  { %v2268_v9 = vpop.permute.xlu1 %579 }
 0x1aa   :  { %vm600_vm10 = vcmp.eq.s32.totalorder %v2213_v26, %v2268_v9 }
 0x1ab   :  { %v1591_v35 = vsel %vm600_vm10, 1.0, %v2019_v1  ;;  %vm1515_vm10 = vcmask 786112  }
 0x1ad   :  { %v583_v18 = vpop.permute.xlu1 %582 }
 0x1ae   :  { %vm601_vm13 = vcmp.eq.s32.totalorder %v2213_v26, %v583_v18 }
 0x1af   :  { %v1592_v38 = vsel %vm601_vm13, 1.0, %v2019_v1  ;;  %vm1536_vm13 = vcmask 982912  }
 0x1b2   :  { %v679_v27 = vpop.permute.xlu1 %678 }
 0x1b3   :  { %vm697_vm11 = vcmp.eq.s32.totalorder %v2213_v26, %v679_v27 }
 0x1b4   :  { %v1608_v36 = vsel %vm697_vm11, 1.0, %v2019_v1  ;;  %vm1522_vm11 = vcmask 851712  }
 0x1b6   :  { %v682_v34 = vpop.permute.xlu1 %681 }
 0x1b7   :  { %vm698_vm15 = vcmp.eq.s32.totalorder %v2213_v26, %v682_v34 }
 0x1b8   :  { %v1609_v40 = vsel %vm698_vm15, 1.0, %v2019_v1 }
 0x25e   :  { %v1770_v58 = vpop.f32.mrf.mxu1 }
 0x25f   :  { %1810 = vmatprep.subr.mxu0 %v1770_v58  ;;  %v1781_v59 = vpop.f32.mrf.mxu0 }
 0x260   :  { %v427_v60 = vpop.f32.mrf.mxu1  ;;  %1811 = vmatpush3.msra.mxu0 %v1770_v58  ;;  %1782 = vmatprep.subr.msk.mxu1 %vm66_vm0, %v1781_v59 }
 0x261   :  { %1812 = vmatprep.subr.mxu0 %v427_v60  ;;  %v512_v61 = vpop.f32.mrf.mxu0  ;;  %1783 = vmatpush3.msk.msra.mxu1 %vm66_vm0, %v1781_v59  ;;  %vm686_vm0 = vcmp.eq.s32.totalorder %v2213_v26, %v646_v43  ;;  %v2353_v43 = vld [vmem:[%s2478_s7 + $0x40] ss:$0 sm:$0xff] }
 0x262   :  { %1813 = vmatpush3.msra.mxu0 %v427_v60  ;;  %1784 = vmatprep.subr.mxu1 %v512_v61  ;;  %v1597_v7 = vsel %vm686_vm0, 1.0, %v2019_v1  ;;  %vm597_vm0 = vcmp.eq.s32.totalorder %v2213_v26, %v2233_v52 }
 0x263   :  { %1815 = vmatmul.mubr.msk.f32.vlgmr.msra.gmra.mxu0 %vm183_vm5, %v1579_v63  ;;  %1785 = vmatpush3.msra.mxu1 %v512_v61  ;;  %v1588_v25 = vsel %vm597_vm0, 1.0, %v2019_v1  ;;  %vm1473_vm0 = vcmask 392512  }
 0x264   :  { %1817 = vmatprep.mubr.msk.f32.mxu0 %vm183_vm5, %v1580_v2  ;;  %1787 = vmatmul.mubr.msk.f32.vlgmr.msra.gmra.mxu1 %vm267_vm7, %v1595_v3 }
 0x265   :  { %1789 = vmatprep.mubr.msk.f32.mxu1 %vm267_vm7, %v1596_v4 }
 0x267   :  { %1818 = vmatmul.mubr.msk.f32.gmra.mxu0 %vm183_vm5, %v1581_v5 }
 0x268   :  { %1820 = vmatprep.mubr.msk.f32.mxu0 %vm183_vm5, %v1582_v8  ;;  %1790 = vmatmul.mubr.msk.f32.gmra.mxu1 %vm267_vm7, %v1597_v7 }
 0x269   :  { %1792 = vmatprep.mubr.msk.f32.mxu1 %vm267_vm7, %v1598_v10 }
 0x26b   :  { %1821 = vmatmul.mubr.msk.f32.gmra.mxu0 %vm183_vm5, %v1583_v11 }
 0x26c   :  { %1823 = vmatprep.mubr.msk.f32.mxu0 %vm183_vm5, %v1584_v13  ;;  %1793 = vmatmul.mubr.msk.f32.gmra.mxu1 %vm267_vm7, %v1599_v12 }
 0x26d   :  { %1795 = vmatprep.mubr.msk.f32.mxu1 %vm267_vm7, %v1600_v14 }
 0x26f   :  { %1824 = vmatmul.mubr.msk.f32.gmra.mxu0 %vm183_vm5, %v1585_v19 }
 0x270   :  { %1826 = vmatprep.mubr.msk.f32.mxu0 %vm183_vm5, %v1586_v20  ;;  %1796 = vmatmul.mubr.msk.f32.gmra.mxu1 %vm267_vm7, %v1601_v17 }
 0x271   :  { %1798 = vmatprep.mubr.msk.f32.mxu1 %vm267_vm7, %v1602_v21 }
 0x273   :  { %1827 = vmatmul.mubr.msk.f32.gmra.mxu0 %vm183_vm5, %v1587_v22 }
 0x274   :  { %1829 = vmatprep.mubr.msk.f32.mxu0 %vm183_vm5, %v1588_v25  ;;  %1799 = vmatmul.mubr.msk.f32.gmra.mxu1 %vm267_vm7, %v1603_v24 }
 0x275   :  { %1801 = vmatprep.mubr.msk.f32.mxu1 %vm267_vm7, %v1604_v28 }
 0x277   :  { %1830 = vmatmul.mubr.msk.f32.gmra.mxu0 %vm183_vm5, %v1589_v29 }
 0x278   :  { %1832 = vmatprep.mubr.msk.f32.mxu0 %vm183_vm5, %v1590_v31  ;;  %1802 = vmatmul.mubr.msk.f32.gmra.mxu1 %vm267_vm7, %v1605_v32 }
 0x279   :  { %1804 = vmatprep.mubr.msk.f32.mxu1 %vm267_vm7, %v1606_v33 }
 0x27b   :  { %1833 = vmatmul.mubr.msk.f32.gmra.mxu0 %vm183_vm5, %v1591_v35 }
 0x27c   :  { %1835 = vmatprep.mubr.msk.f32.mxu0 %vm183_vm5, %v1592_v38  ;;  %1805 = vmatmul.mubr.msk.f32.gmra.mxu1 %vm267_vm7, %v1607_v37 }
 0x27d   :  { %1807 = vmatprep.mubr.msk.f32.mxu1 %vm267_vm7, %v1608_v36 }
 0x27f   :  { %1836 = vmatmul.mubr.msk.f32.gmra.mxu0 %vm183_vm5, %v1593_v39  ;;  %vm1445_vm5 = vcmask 130112  }
 0x280   :  { %1808 = vmatmul.mubr.msk.f32.gmra.mxu1 %vm267_vm7, %v1609_v40  ;;  %vm1452_vm7 = vcmask 195712  }
 0x323   :  { %v1816_v41 = vpop.f32.mrf.mxu0 }
 0x324   :  { %v1788_v42 = vpop.f32.mrf.mxu1 }
 0x325   :  { %v1041_v44 = vpop.f32.mrf.mxu0  ;;  %v1047_v45 = vadd.f32 %v1816_v41, %v1788_v42 }
 0x326   :  { %v848_v46 = vpop.f32.mrf.mxu1 }
 0x327   :  { %v1126_v47 = vadd.f32 %v2353_v43, %v1047_v45  ;;  %v1819_v48 = vpop.f32.mrf.mxu0  ;;  %v1042_v49 = vadd.f32 %v1041_v44, %v848_v46 }
 0x328   :  { %v1791_v50 = vpop.f32.mrf.mxu1 }
 0x329   :  { %v1645_v1 = vmul.f32 -1.442695, %v1126_v47  ;;  %v1125_v51 = vadd.f32 %v2353_v43, %v1042_v49  ;;  %v1051_v52 = vpop.f32.mrf.mxu0  ;;  %v1057_v53 = vadd.f32 %v1819_v48, %v1791_v50 }
 0x32a   :  { %v858_v54 = vpop.f32.mrf.mxu1 }
 0x32b   :  { %1869 = vpow2.f32 %v1645_v1  ;;  %v1644_v55 = vmul.f32 -1.442695, %v1125_v51  ;;  %v1128_v56 = vadd.f32 %v2353_v43, %v1057_v53  ;;  %v1822_v57 = vpop.f32.mrf.mxu0  ;;  %v1052_v58 = vadd.f32 %v1051_v52, %v858_v54 }
 0x32c   :  { %v1794_v59 = vpop.f32.mrf.mxu1 }
 0x32d   :  { %1871 = vpow2.f32 %v1644_v55  ;;  %v1647_v60 = vmul.f32 -1.442695, %v1128_v56  ;;  %v1127_v61 = vadd.f32 %v2353_v43, %v1052_v58  ;;  %v1061_v62 = vpop.f32.mrf.mxu0  ;;  %v1067_v63 = vadd.f32 %v1822_v57, %v1794_v59 }
 0x32e   :  { %v868_v0 = vpop.f32.mrf.mxu1 }
 0x32f   :  { %1873 = vpow2.f32 %v1647_v60  ;;  %v1646_v2 = vmul.f32 -1.442695, %v1127_v61  ;;  %v1130_v3 = vadd.f32 %v2353_v43, %v1067_v63  ;;  %v1825_v4 = vpop.f32.mrf.mxu0  ;;  %v1062_v5 = vadd.f32 %v1061_v62, %v868_v0 }
 0x330   :  { %v1797_v6 = vpop.f32.mrf.mxu1 }
 0x331   :  { %1875 = vpow2.f32 %v1646_v2  ;;  %v1649_v7 = vmul.f32 -1.442695, %v1130_v3  ;;  %v1129_v8 = vadd.f32 %v2353_v43, %v1062_v5  ;;  %v1071_v9 = vpop.f32.mrf.mxu0  ;;  %v1077_v10 = vadd.f32 %v1825_v4, %v1797_v6 }
 0x332   :  { %v878_v11 = vpop.f32.mrf.mxu1 }
 0x333   :  { %1877 = vpow2.f32 %v1649_v7  ;;  %v1648_v12 = vmul.f32 -1.442695, %v1129_v8  ;;  %v1132_v13 = vadd.f32 %v2353_v43, %v1077_v10  ;;  %v1828_v14 = vpop.f32.mrf.mxu0  ;;  %v1072_v16 = vadd.f32 %v1071_v9, %v878_v11  ;;  %v2374_v11 = vld [vmem:[%s2478_s7 + $0x41] ss:$0 sm:$0xff] }
 0x334   :  { %v1800_v17 = vpop.f32.mrf.mxu1 }
 0x335   :  { %1879 = vpow2.f32 %v1648_v12  ;;  %v1651_v18 = vmul.f32 -1.442695, %v1132_v13  ;;  %v1131_v19 = vadd.f32 %v2353_v43, %v1072_v16  ;;  %v1081_v20 = vpop.f32.mrf.mxu0  ;;  %v1087_v21 = vadd.f32 %v1828_v14, %v1800_v17 }
 0x336   :  { %v888_v22 = vpop.f32.mrf.mxu1 }
 0x337   :  { %1881 = vpow2.f32 %v1651_v18  ;;  %v1650_v23 = vmul.f32 -1.442695, %v1131_v19  ;;  %v1134_v24 = vadd.f32 %v2353_v43, %v1087_v21  ;;  %v1831_v25 = vpop.f32.mrf.mxu0  ;;  %v1082_v27 = vadd.f32 %v1081_v20, %v888_v22 }
 0x338   :  { %v1870_v28 = vpop.eup %1869  ;;  %v1803_v29 = vpop.f32.mrf.mxu1 }
 0x339   :  { %v1190_v30 = vadd.f32 1.0, %v1870_v28  ;;  %1883 = vpow2.f32 %v1650_v23  ;;  %v1653_v31 = vmul.f32 -1.442695, %v1134_v24  ;;  %v1133_v32 = vadd.f32 %v2353_v43, %v1082_v27  ;;  %v1091_v33 = vpop.f32.mrf.mxu0 }
 0x33a   :  { %v1872_v34 = vpop.eup %1871  ;;  %v1097_v35 = vadd.f32 %v1831_v25, %v1803_v29  ;;  %v898_v36 = vpop.f32.mrf.mxu1 }
 0x33b   :  { %1885 = vrcp.f32 %v1190_v30  ;;  %v1189_v37 = vadd.f32 1.0, %v1872_v34  ;;  %v1652_v38 = vmul.f32 -1.442695, %v1133_v32  ;;  %v1834_v39 = vpop.f32.mrf.mxu0  ;;  %v1092_v40 = vadd.f32 %v1091_v33, %v898_v36 }
 0x33c   :  { %v1874_v41 = vpop.eup %1873  ;;  %1887 = vpow2.f32 %v1653_v31  ;;  %v1136_v42 = vadd.f32 %v2353_v43, %v1097_v35  ;;  %v1806_v44 = vpop.f32.mrf.mxu1 }
 0x33d   :  { %1889 = vrcp.f32 %v1189_v37  ;;  %v1192_v45 = vadd.f32 1.0, %v1874_v41  ;;  %v1135_v46 = vadd.f32 %v2353_v43, %v1092_v40  ;;  %v1101_v47 = vpop.f32.mrf.mxu0  ;;  %v1107_v48 = vadd.f32 %v1834_v39, %v1806_v44 }
 0x33e   :  { %v1876_v49 = vpop.eup %1875  ;;  %1891 = vpow2.f32 %v1652_v38  ;;  %v1655_v50 = vmul.f32 -1.442695, %v1136_v42  ;;  %v908_v1 = vpop.f32.mrf.mxu1 }
 0x33f   :  { %1893 = vrcp.f32 %v1192_v45  ;;  %v1191_v51 = vadd.f32 1.0, %v1876_v49  ;;  %v1654_v52 = vmul.f32 -1.442695, %v1135_v46  ;;  %v1138_v53 = vadd.f32 %v2353_v43, %v1107_v48  ;;  %v1837_v54 = vpop.f32.mrf.mxu0 }
 0x340   :  { %v1878_v55 = vpop.eup %1877  ;;  %1895 = vpow2.f32 %v1655_v50  ;;  %v1102_v56 = vadd.f32 %v1101_v47, %v908_v1  ;;  %v1809_v57 = vpop.f32.mrf.mxu1 }
 0x341   :  { %1897 = vrcp.f32 %v1191_v51  ;;  %v1194_v58 = vadd.f32 1.0, %v1878_v55  ;;  %v1657_v59 = vmul.f32 -1.442695, %v1138_v53  ;;  %v1117_v60 = vadd.f32 %v1837_v54, %v1809_v57  ;;  %v1111_v61 = vpop.f32.mrf.mxu0 }
 0x342   :  { %v1880_v62 = vpop.eup %1879  ;;  %1899 = vpow2.f32 %v1654_v52  ;;  %v1137_v63 = vadd.f32 %v2353_v43, %v1102_v56  ;;  %v918_v0 = vpop.f32.mrf.mxu1 }
 0x343   :  { %1901 = vrcp.f32 %v1194_v58  ;;  %v1193_v2 = vadd.f32 1.0, %v1880_v62  ;;  %v1140_v3 = vadd.f32 %v2353_v43, %v1117_v60  ;;  %v1112_v4 = vadd.f32 %v1111_v61, %v918_v0 }
 0x344   :  { %v1882_v5 = vpop.eup %1881  ;;  %1903 = vpow2.f32 %v1657_v59  ;;  %v1656_v6 = vmul.f32 -1.442695, %v1137_v63 }
 0x345   :  { %1905 = vrcp.f32 %v1193_v2  ;;  %v1196_v7 = vadd.f32 1.0, %v1882_v5  ;;  %v1659_v8 = vmul.f32 -1.442695, %v1140_v3  ;;  %v1139_v9 = vadd.f32 %v2353_v43, %v1112_v4 }
 0x346   :  { %v1884_v10 = vpop.eup %1883  ;;  %1907 = vpow2.f32 %v1656_v6 }
 0x347   :  { %1909 = vrcp.f32 %v1196_v7  ;;  %v1195_v12 = vadd.f32 1.0, %v1884_v10  ;;  %v1658_v13 = vmul.f32 -1.442695, %v1139_v9 }
 0x348   :  { %v1886_v14 = vpop.eup %1885  ;;  %1911 = vpow2.f32 %v1659_v8 }
 0x349   :  { %v1888_v16 = vpop.eup %1887  ;;  %1913 = vrcp.f32 %v1195_v12  ;;  %v1243_v17 = vmul.f32 %v1886_v14, %v2374_v11 }
 0x34a   :  { %v1890_v18 = vpop.eup %1889  ;;  %v1198_v19 = vadd.f32 1.0, %v1888_v16  ;;  %1915 = vpow2.f32 %v1658_v13 }
 0x34b   :  { %v1892_v43 = vpop.eup %1891  ;;  %v1261_v20 = vsel %vm354_vm9, %v1243_v17, 0.0  ;;  %v1242_v21 = vmul.f32 %v1890_v18, %v2374_v11  ;;  %v2411_v18 = vstv %s2480_s9  ;;  %s2025_s9 = smov [#allocation3]  }
 0x34c   :  { %v1894_v22 = vpop.eup %1893  ;;  %1917 = vrcp.f32 %v1198_v19  ;;  %v1197_v23 = vadd.f32 1.0, %v1892_v43  ;;  %1262 = vadd.xlane.f32.xlu0 %v1261_v20  ;;  %s1553_s27 = sshll.u32 %s2025_s9, 4  ;;  %s1554_s27 = int_to_ptr.vmem [resolvable:$true] %s1553_s27 }
 0x34d   :  { %v1896_v24 = vpop.eup %1895  ;;  %v1258_v25 = vsel %vm354_vm9, %v1242_v21, 0.0  ;;  %v1245_v27 = vmul.f32 %v1894_v22, %v2374_v11  ;;  %s1997_s6 = scalar_lea.vmem %s1554_s27, 16  ;;  %s2001_s28 = scalar_lea.vmem %s1554_s27, 32 }
 0x34e   :  { %v1898_v28 = vpop.eup %1897  ;;  %1919 = vrcp.f32 %v1197_v23  ;;  %v1200_v29 = vadd.f32 1.0, %v1896_v24  ;;  %1259 = vadd.xlane.f32.xlu1 %v1258_v25  ;;  %p1998_p0 = scmp.ne.s32.totalorder %s1554_s27, %s1997_s6  ;;  %p2002_p1 = scmp.lt.s32.totalorder %s1554_s27, %s1554_s27 }
 0x34f   :  { %v1900_v30 = vpop.eup %1899  ;;  %v1267_v31 = vsel %vm354_vm9, %v1245_v27, 0.0  ;;  %v1244_v32 = vmul.f32 %v1898_v28, %v2374_v11  ;;  %p2003_p2 = scmp.lt.s32.totalorder %s2001_s28, %s1997_s6 }
 0x350   :  { %v1902_v33 = vpop.eup %1901  ;;  %1921 = vrcp.f32 %v1200_v29  ;;  %v1199_v34 = vadd.f32 1.0, %v1900_v30  ;;  %1268 = vadd.xlane.f32.xlu0 %v1267_v31 }
 0x351   :  { %v1904_v35 = vpop.eup %1903  ;;  %v1264_v39 = vsel %vm354_vm9, %v1244_v32, 0.0  ;;  %v1247_v41 = vmul.f32 %v1902_v33, %v2374_v11  ;;  %p2004_p3 = por %p2003_p2, %p2002_p1 }
 0x352   :  { %v1906_v36 = vpop.eup %1905  ;;  %1923 = vrcp.f32 %v1199_v34  ;;  %v1202_v37 = vadd.f32 1.0, %v1904_v35 }
 0x353   :  { %v1908_v38 = vpop.eup %1907  ;;  %v1246_v40 = vmul.f32 %v1906_v36, %v2374_v11  ;;  %v1273_v50 = vsel %vm354_vm9, %v1247_v41, 0.0  ;;  %p2005_p4 = pnand %p2004_p3, %p1998_p0 }
 0x354   :  { %v1910_v42 = vpop.eup %1909  ;;  %1925 = vrcp.f32 %v1202_v37  ;;  %v1201_v44 = vadd.f32 1.0, %v1908_v38  ;;  %1265 = vadd.xlane.f32.xlu0 %v1264_v39 }
 0x355   :  { %v1912_v45 = vpop.eup %1911  ;;  %v1270_v46 = vsel %vm354_vm9, %v1246_v40, 0.0  ;;  %v1249_v51 = vmul.f32 %v1910_v42, %v2374_v11 }
 0x356   :  { %v1914_v47 = vpop.eup %1913  ;;  %1927 = vrcp.f32 %v1201_v44  ;;  %v1204_v48 = vadd.f32 1.0, %v1912_v45  ;;  %1271 = vadd.xlane.f32.xlu1 %v1270_v46 }
 0x357   :  { %v1916_v49 = vpop.eup %1915  ;;  %v1248_v1 = vmul.f32 %v1914_v47, %v2374_v11  ;;  %v1279_v56 = vsel %vm354_vm9, %v1249_v51, 0.0 }
 0x358   :  { %1929 = vrcp.f32 %v1204_v48  ;;  %v1203_v52 = vadd.f32 1.0, %v1916_v49  ;;  %1274 = vadd.xlane.f32.xlu0 %v1273_v50 }
 0x359   :  { %v1918_v53 = vpop.eup %1917  ;;  %v1276_v54 = vsel %vm354_vm9, %v1248_v1, 0.0 }
 0x35a   :  { %1931 = vrcp.f32 %v1203_v52  ;;  %1277 = vadd.xlane.f32.xlu1 %v1276_v54  ;;  %v1251_v57 = vmul.f32 %v1918_v53, %v2374_v11 }
 0x35b   :  { %v1920_v55 = vpop.eup %1919 }
 0x35c   :  { %1280 = vadd.xlane.f32.xlu0 %v1279_v56  ;;  %v1250_v58 = vmul.f32 %v1920_v55, %v2374_v11  ;;  %v1285_v62 = vsel %vm354_vm9, %v1251_v57, 0.0 }
 0x35d   :  { %v1922_v59 = vpop.eup %1921 }
 0x35e   :  { %v1282_v60 = vsel %vm354_vm9, %v1250_v58, 0.0  ;;  %v1253_v63 = vmul.f32 %v1922_v59, %v2374_v11 }
 0x35f   :  { %v1924_v61 = vpop.eup %1923  ;;  %1283 = vadd.xlane.f32.xlu1 %v1282_v60 }
 0x360   :  { %1286 = vadd.xlane.f32.xlu0 %v1285_v62  ;;  %v1252_v0 = vmul.f32 %v1924_v61, %v2374_v11  ;;  %v1291_v5 = vsel %vm354_vm9, %v1253_v63, 0.0 }
 0x361   :  { %v1926_v2 = vpop.eup %1925 }
 0x362   :  { %v1288_v3 = vsel %vm354_vm9, %v1252_v0, 0.0  ;;  %v1255_v6 = vmul.f32 %v1926_v2, %v2374_v11 }
 0x363   :  { %v1928_v4 = vpop.eup %1927  ;;  %1289 = vadd.xlane.f32.xlu1 %v1288_v3 }
 0x364   :  { %1292 = vadd.xlane.f32.xlu0 %v1291_v5  ;;  %v1254_v7 = vmul.f32 %v1928_v4, %v2374_v11  ;;  %v1297_v12 = vsel %vm354_vm9, %v1255_v6, 0.0 }
 0x365   :  { %v1930_v8 = vpop.eup %1929 }
 0x366   :  { %v1294_v9 = vsel %vm354_vm9, %v1254_v7, 0.0  ;;  %v1257_v13 = vmul.f32 %v1930_v8, %v2374_v11 }
 0x367   :  { %v1932_v10 = vpop.eup %1931  ;;  %1295 = vadd.xlane.f32.xlu1 %v1294_v9 }
 0x368   :  { %1298 = vadd.xlane.f32.xlu0 %v1297_v12  ;;  %v1256_v14 = vmul.f32 %v1932_v10, %v2374_v11  ;;  %v1303_v17 = vsel %vm354_vm9, %v1257_v13, 0.0 }
 0x36a   :  { %v1300_v16 = vsel %vm354_vm9, %v1256_v14, 0.0  ;;  %vm1459_vm9 = vcmask 261312  }
 0x36b   :  { %1301 = vadd.xlane.f32.xlu1 %v1300_v16 }
 0x36c   :  { %1304 = vadd.xlane.f32.xlu0 %v1303_v17  ;;  %v2430_v17 = vshrl.u32 %v537_v15, 7  ;;  %v1461_v15 = vadd.s32 4294967264, %v2213_v26 }
 0x3d5   :  { %v1263_v19 = vpop.xlane.xlu0 %1262 }
 0x3d6   :  { %v1309_v43 = vadd.f32 %v2411_v18, %v1263_v19  ;;  %v1440_v19 = vadd.s32 4294967288, %v2213_v26 }
 0x3d7   :  { %v1260_v20 = vpop.xlane.xlu1 %1259 }
 0x3d8   :  { %v1662_v21 = vmul.f32 -1.442695, %v1309_v43  ;;  %v1308_v22 = vadd.f32 %v2411_v18, %v1260_v20 }
 0x3d9   :  { %v1269_v23 = vpop.xlane.xlu0 %1268 }
 0x3da   :  { %1933 = vpow2.f32 %v1662_v21  ;;  %v1661_v11 = vmul.f32 -1.442695, %v1308_v22  ;;  %v1311_v24 = vadd.f32 %v2411_v18, %v1269_v23  ;;  %v1447_v21 = vadd.s32 4294967280, %v2213_v26 }
 0x3dc   :  { %1935 = vpow2.f32 %v1661_v11  ;;  %v1664_v25 = vmul.f32 -1.442695, %v1311_v24  ;;  %v1438_v11 = vsub.s32 %v2213_v26, %v2430_v17  ;;  %v1454_v24 = vadd.s32 4294967272, %v2213_v26 }
 0x3dd   :  { %v1266_v27 = vpop.xlane.xlu0 %1265 }
 0x3de   :  { %1937 = vpow2.f32 %v1664_v25  ;;  %v1310_v28 = vadd.f32 %v2411_v18, %v1266_v27 }
 0x3df   :  { %v1272_v29 = vpop.xlane.xlu1 %1271 }
 0x3e0   :  { %v1663_v30 = vmul.f32 -1.442695, %v1310_v28  ;;  %v1312_v31 = vadd.f32 %v2411_v18, %v1272_v29  ;;  %v1443_v28 = vsub.s32 %v1440_v19, %v2430_v17  ;;  %v1510_v19 = vadd.s32 4294967208, %v2213_v26 }
 0x3e1   :  { %v1275_v32 = vpop.xlane.xlu0 %1274 }
 0x3e2   :  { %1939 = vpow2.f32 %v1663_v30  ;;  %v1665_v33 = vmul.f32 -1.442695, %v1312_v31  ;;  %v1313_v34 = vadd.f32 %v2411_v18, %v1275_v32  ;;  %v1450_v31 = vsub.s32 %v1447_v21, %v2430_v17 }
 0x3e3   :  { %v1278_v35 = vpop.xlane.xlu1 %1277  ;;  %v1468_v32 = vadd.s32 4294967256, %v2213_v26 }
 0x3e4   :  { %1941 = vpow2.f32 %v1665_v33  ;;  %v1666_v36 = vmul.f32 -1.442695, %v1313_v34  ;;  %v1314_v37 = vadd.f32 %v2411_v18, %v1278_v35  ;;  %v1457_v35 = vsub.s32 %v1454_v24, %v2430_v17 }
 0x3e5   :  { %v1281_v38 = vpop.xlane.xlu0 %1280 }
 0x3e6   :  { %1943 = vpow2.f32 %v1666_v36  ;;  %v1667_v39 = vmul.f32 -1.442695, %v1314_v37  ;;  %v1315_v40 = vadd.f32 %v2411_v18, %v1281_v38  ;;  %v1464_v38 = vsub.s32 %v1461_v15, %v2430_v17 }
 0x3e7   :  { %v1934_v41 = vpop.eup %1933  ;;  %v1524_v15 = vadd.s32 4294967192, %v2213_v26 }
 0x3e8   :  { %1945 = vpow2.f32 %v1667_v39  ;;  %v1668_v42 = vmul.f32 -1.442695, %v1315_v40  ;;  %v1284_v44 = vpop.xlane.xlu1 %1283  ;;  %v1373_v48 = vadd.f32 1.0, %v1934_v41  ;;  %v1475_v39 = vadd.s32 4294967248, %v2213_v26 }
 0x3e9   :  { %v1936_v45 = vpop.eup %1935  ;;  %v1316_v46 = vadd.f32 %v2411_v18, %v1284_v44  ;;  %v1287_v47 = vpop.xlane.xlu0 %1286 }
 0x3ea   :  { %v1372_v49 = vadd.f32 1.0, %v1936_v45  ;;  %v1317_v50 = vadd.f32 %v2411_v18, %v1287_v47  ;;  %1947 = vpow2.f32 %v1668_v42  ;;  %v1482_v47 = vadd.s32 4294967240, %v2213_v26 }
 0x3eb   :  { %v1938_v1 = vpop.eup %1937  ;;  %v1669_v51 = vmul.f32 -1.442695, %v1316_v46  ;;  %v1471_v46 = vsub.s32 %v1468_v32, %v2430_v17 }
 0x3ec   :  { %1949 = vrcp.f32 %v1372_v49  ;;  %v1375_v52 = vadd.f32 1.0, %v1938_v1  ;;  %v1670_v53 = vmul.f32 -1.442695, %v1317_v50  ;;  %v1290_v54 = vpop.xlane.xlu1 %1289 }
 0x3ed   :  { %1951 = vpow2.f32 %v1669_v51  ;;  %v1318_v55 = vadd.f32 %v2411_v18, %v1290_v54  ;;  %v1293_v56 = vpop.xlane.xlu0 %1292  ;;  %v1478_v54 = vsub.s32 %v1475_v39, %v2430_v17 }
 0x3ee   :  { %1953 = vrcp.f32 %v1373_v48  ;;  %v1319_v57 = vadd.f32 %v2411_v18, %v1293_v56 }
 0x3ef   :  { %v1940_v58 = vpop.eup %1939  ;;  %1955 = vpow2.f32 %v1670_v53  ;;  %v1671_v59 = vmul.f32 -1.442695, %v1318_v55 }
 0x3f0   :  { %1957 = vrcp.f32 %v1375_v52  ;;  %v1374_v60 = vadd.f32 1.0, %v1940_v58  ;;  %v1672_v61 = vmul.f32 -1.442695, %v1319_v57  ;;  %v1296_v62 = vpop.xlane.xlu1 %1295  ;;  %v1489_v57 = vadd.s32 4294967232, %v2213_v26 }
 0x3f1   :  { %v1942_v63 = vpop.eup %1941  ;;  %1959 = vpow2.f32 %v1671_v59  ;;  %v1320_v0 = vadd.f32 %v2411_v18, %v1296_v62  ;;  %v1299_v2 = vpop.xlane.xlu0 %1298  ;;  %v1485_v62 = vsub.s32 %v1482_v47, %v2430_v17 }
 0x3f2   :  { %1961 = vrcp.f32 %v1374_v60  ;;  %v1376_v3 = vadd.f32 1.0, %v1942_v63  ;;  %v1321_v4 = vadd.f32 %v2411_v18, %v1299_v2 }
 0x3f3   :  { %v1944_v5 = vpop.eup %1943  ;;  %1963 = vpow2.f32 %v1672_v61  ;;  %v1673_v6 = vmul.f32 -1.442695, %v1320_v0  ;;  %v1496_v0 = vadd.s32 4294967224, %v2213_v26 }
 0x3f4   :  { %1965 = vrcp.f32 %v1376_v3  ;;  %v1377_v7 = vadd.f32 1.0, %v1944_v5  ;;  %v1674_v8 = vmul.f32 -1.442695, %v1321_v4  ;;  %v1302_v9 = vpop.xlane.xlu1 %1301 }
 0x3f5   :  { %v1946_v10 = vpop.eup %1945  ;;  %1967 = vpow2.f32 %v1673_v6  ;;  %v1322_v12 = vadd.f32 %v2411_v18, %v1302_v9  ;;  %v1305_v13 = vpop.xlane.xlu0 %1304  ;;  %v1503_v9 = vadd.s32 4294967216, %v2213_v26 }
 0x3f6   :  { %1969 = vrcp.f32 %v1377_v7  ;;  %v1378_v14 = vadd.f32 1.0, %v1946_v10  ;;  %v1323_v16 = vadd.f32 %v2411_v18, %v1305_v13  ;;  %v1492_v7 = vsub.s32 %v1489_v57, %v2430_v17 }
 0x3f7   :  { %1971 = vpow2.f32 %v1674_v8  ;;  %v1675_v43 = vmul.f32 -1.442695, %v1322_v12  ;;  %v1948_v20 = vpop.eup %1947 }
 0x3f8   :  { %1973 = vrcp.f32 %v1378_v14  ;;  %v1676_v22 = vmul.f32 -1.442695, %v1323_v16  ;;  %v1379_v25 = vadd.f32 1.0, %v1948_v20  ;;  %v1499_v16 = vsub.s32 %v1496_v0, %v2430_v17 }
 0x3f9   :  { %v1950_v23 = vpop.eup %1949  ;;  %1975 = vpow2.f32 %v1675_v43 }
 0x3fa   :  { %v1952_v18 = vpop.eup %1951  ;;  %1977 = vpow2.f32 %v1676_v22  ;;  %v1439_v34 = vrot.slane %v1950_v23, %v1438_v11  ;;  %v1506_v22 = vsub.s32 %v1503_v9, %v2430_v17  ;;  %v1517_v23 = vadd.s32 4294967200, %v2213_v26 }
 0x3fb   :  { %v1954_v27 = vpop.eup %1953  ;;  %1979 = vrcp.f32 %v1379_v25  ;;  %v1380_v29 = vadd.f32 1.0, %v1952_v18  ;;  %v1513_v18 = vsub.s32 %v1510_v19, %v2430_v17 }
 0x3fc   :  { %v1956_v30 = vpop.eup %1955  ;;  %v1444_v41 = vrot.slane %v1954_v27, %v1443_v28 }
 0x3fd   :  { %v1958_v33 = vpop.eup %1957  ;;  %1981 = vrcp.f32 %v1380_v29  ;;  %v1381_v36 = vadd.f32 1.0, %v1956_v30  ;;  %v1520_v30 = vsub.s32 %v1517_v23, %v2430_v17 }
 0x3fe   :  { %v1960_v37 = vpop.eup %1959  ;;  %v1446_v49 = vsel %vm1445_vm5, %v1444_v41, %v1439_v34  ;;  %v1458_v50 = vrot.slane %v1958_v33, %v1457_v35  ;;  %v1538_v33 = vadd.s32 4294967176, %v2213_v26 }
 0x3ff   :  { %v1962_v40 = vpop.eup %1961  ;;  %1983 = vrcp.f32 %v1381_v36  ;;  %v1382_v42 = vadd.f32 1.0, %v1960_v37  ;;  %v1527_v36 = vsub.s32 %v1524_v15, %v2430_v17 }
 0x400   :  { %v1964_v44 = vpop.eup %1963  ;;  %v1451_v45 = vrot.slane %v1962_v40, %v1450_v31  ;;  %v1531_v31 = vadd.s32 4294967184, %v2213_v26 }
 0x401   :  { %v1966_v48 = vpop.eup %1965  ;;  %1985 = vrcp.f32 %v1382_v42  ;;  %v1383_v1 = vadd.f32 1.0, %v1964_v44  ;;  %v1541_v42 = vsub.s32 %v1538_v33, %v2430_v17 }
 0x402   :  { %v1968_v51 = vpop.eup %1967  ;;  %v1453_v52 = vsel %vm1452_vm7, %v1451_v45, %v1446_v49  ;;  %v1465_v53 = vrot.slane %v1966_v48, %v1464_v38  ;;  %v1534_v40 = vsub.s32 %v1531_v31, %v2430_v17 }
 0x403   :  { %v1970_v55 = vpop.eup %1969  ;;  %v1460_v56 = vsel %vm1459_vm9, %v1458_v50, %v1453_v52  ;;  %1987 = vrcp.f32 %v1383_v1  ;;  %v1384_v58 = vadd.f32 1.0, %v1968_v51 }
 0x404   :  { %v1972_v59 = vpop.eup %1971  ;;  %v1467_v60 = vsel %vm1466_vm1, %v1465_v53, %v1460_v56  ;;  %v1472_v61 = vrot.slane %v1970_v55, %v1471_v46 }
 0x405   :  { %v1974_v63 = vpop.eup %1973  ;;  %1989 = vrcp.f32 %v1384_v58  ;;  %v1385_v2 = vadd.f32 1.0, %v1972_v59 }
 0x406   :  { %v1976_v3 = vpop.eup %1975  ;;  %v1474_v4 = vsel %vm1473_vm0, %v1472_v61, %v1467_v60  ;;  %v1479_v5 = vrot.slane %v1974_v63, %v1478_v54 }
 0x407   :  { %v1978_v6 = vpop.eup %1977  ;;  %1991 = vrcp.f32 %v1385_v2  ;;  %v1386_v8 = vadd.f32 1.0, %v1976_v3 }
 0x408   :  { %v1980_v10 = vpop.eup %1979  ;;  %v1387_v12 = vadd.f32 1.0, %v1978_v6  ;;  %v1481_v13 = vsel %vm1480_vm2, %v1479_v5, %v1474_v4 }
 0x409   :  { %v1486_v14 = vrot.slane %v1980_v10, %v1485_v62  ;;  %1993 = vrcp.f32 %v1386_v8 }
 0x40a   :  { %v1982_v43 = vpop.eup %1981  ;;  %1995 = vrcp.f32 %v1387_v12 }
 0x40b   :  { %v1493_v20 = vrot.slane %v1982_v43, %v1492_v7  ;;  %v1488_v21 = vsel %vm1487_vm3, %v1486_v14, %v1481_v13 }
 0x40c   :  { %v1984_v11 = vpop.eup %1983 }
 0x40d   :  { %v1500_v24 = vrot.slane %v1984_v11, %v1499_v16  ;;  %v1495_v25 = vsel %vm1494_vm4, %v1493_v20, %v1488_v21 }
 0x40e   :  { %v1986_v27 = vpop.eup %1985 }
 0x40f   :  { %v1502_v28 = vsel %vm1501_vm6, %v1500_v24, %v1495_v25  ;;  %v1507_v29 = vrot.slane %v1986_v27, %v1506_v22 }
 0x410   :  { %v1988_v32 = vpop.eup %1987 }
 0x411   :  { %v1509_v34 = vsel %vm1508_vm8, %v1507_v29, %v1502_v28  ;;  %v1514_v35 = vrot.slane %v1988_v32, %v1513_v18 }
 0x412   :  { %v1990_v37 = vpop.eup %1989 }
 0x413   :  { %v1516_v38 = vsel %vm1515_vm10, %v1514_v35, %v1509_v34  ;;  %v1521_v39 = vrot.slane %v1990_v37, %v1520_v30 }
 0x414   :  { %v1992_v41 = vpop.eup %1991 }
 0x415   :  { %v1523_v44 = vsel %vm1522_vm11, %v1521_v39, %v1516_v38  ;;  %v1528_v45 = vrot.slane %v1992_v41, %v1527_v36 }
 0x416   :  { %v1994_v46 = vpop.eup %1993 }
 0x417   :  { %v1996_v26 = vpop.eup %1995  ;;  %v1530_v47 = vsel %vm1529_vm12, %v1528_v45, %v1523_v44  ;;  %v1535_v48 = vrot.slane %v1994_v46, %v1534_v40 }
 0x418   :  { %v1542_v49 = vrot.slane %v1996_v26, %v1541_v42 }
 0x419   :  { %v1537_v50 = vsel %vm1536_vm13, %v1535_v48, %v1530_v47 }
 0x41a   :  { %v1544_v1 = vsel %vm1543_vm14, %v1542_v49, %v1537_v50 }
 0x41b   :  { %1546 = vst [vmem:[#allocation3] sm:$0x1] %v1544_v1 }
 0x41c   :  { %2008 = shalt.err (!%p2005_p4)
}
 0x41d   :  { %1556 = dma.vmem_to_hbm [thread:$0]  %s1554_s27, 16, %s2481_s10, [#allocation4]  }
 0x41e   :  { %2017 = dma.done.wait [#allocation4], 16  }
 0x41f   :  { %2018 = vsyncadd [#allocation4], 4294967280 }
 0x420   :  { %1560 = vsyncpa [#allocation4], 1 }

</bundles_post_ra>
